<compile_context>
chip_gen: v7x
topology: tpu7x:2x2x1
jax: 0.10.0
libtpu: 0.0.40
codegen_flags: <defaults>
</compile_context>

<pallas_src>
import functools

import jax
import jax.numpy as jnp
import numpy as np
from jax import lax
from jax.experimental import pallas as pl
from jax.experimental.pallas import tpu as pltpu

GAM = 0.05
EPS = 1e-6


def _round_up(a, b):
    return ((a + b - 1) // b) * b


def _nan_to_num_f32(r):
    """Match torch.nan_to_num defaults: nan->0, +inf->f32 max, -inf->f32 min."""
    big = jnp.finfo(jnp.float32).max
    small = jnp.finfo(jnp.float32).min
    r = jnp.where(jnp.isnan(r), jnp.float32(0.0), r)
    r = jnp.where(r == jnp.inf, big, r)
    r = jnp.where(r == -jnp.inf, small, r)
    return r


def _gamma_linear_kernel(x_ref, w_ref, b_ref, o_ref, accz_ref, accpq_ref, *, gam):
    """One (m, n) output tile, accumulated over the K grid axis (innermost).

    x_ref: [tm, tk] f32   activation tile
    w_ref: [tn, tk] f32   weight tile (torch [N, K] layout)
    b_ref: [3, tn]  f32   folded bias rows (b, b01, b23)
    o_ref: [tm, tn] f32   output tile
    accz_ref / accpq_ref: [tm, tn] f32 VMEM accumulators (x@W.T and gamma term)
    """
    k = pl.program_id(2)

    @pl.when(k == 0)
    def _():
        accz_ref[...] = jnp.zeros_like(accz_ref)
        accpq_ref[...] = jnp.zeros_like(accpq_ref)

    x = x_ref[...]
    w = w_ref[...]

    xn = jnp.minimum(x, 0.0)        # x.clamp(max=0)
    xa = jnp.abs(x)                 # relu(x) - min(x, 0)
    relu_w = jnp.maximum(w, 0.0)    # fused on the VPU, hidden under the MXU

    # Contract K (last dim of both operands): A @ B.T directly on the MXU.
    dn = (((1,), (1,)), ((), ()))

    # z = x @ W.T stays full f32 (it is the value the forward returns).
    accz_ref[...] += lax.dot_general(x, w, dn, preferred_element_type=jnp.float32)

    # Gamma-correction term only gates zp (cancels in zp * (z / zp)):
    # single-pass bf16 matmuls with an f32 accumulator are plenty.
    s1 = lax.dot_general(xn.astype(jnp.bfloat16), w.astype(jnp.bfloat16), dn,
                         preferred_element_type=jnp.float32)
    s2 = lax.dot_general(xa.astype(jnp.bfloat16), relu_w.astype(jnp.bfloat16), dn,
                         preferred_element_type=jnp.float32)
    accpq_ref[...] += s1 + s2       # == relu(x)@relu(W).T + min(x,0)@min(W,0).T

    @pl.when(k == pl.num_programs(2) - 1)
    def _():
        z_nb = accz_ref[...]
        pq = accpq_ref[...]
        bmat = b_ref[...]
        b = bmat[0:1, :]            # b
        b01 = bmat[1:2, :]          # (b + gam*b+) + b
        b23 = bmat[2:3, :]          # (b + gam*b-) + b

        z = z_nb + b
        out01 = z_nb + gam * pq + b01                 # out0 + out1
        out23 = (1.0 + gam) * z_nb - gam * pq + b23   # out2 + out3

        zp = jnp.where(z > EPS, out01, 0.0) + jnp.where(z < EPS, out23, 0.0)
        ratio = _nan_to_num_f32(z / zp)
        o_ref[...] = (zp * ratio).astype(o_ref.dtype)


def _vmem_capacity_bytes():
    """Per-generation VMEM capacity; conservative 64 MiB (v7x) fallback."""
    default = 64 * 1024 * 1024
    try:
        cap = int(pltpu.get_tpu_info().vmem_capacity_bytes)
        return cap if cap >= 32 * 1024 * 1024 else default
    except Exception:
        return default


def _largest_tile(padded, cap):
    """Largest multiple of 128 <= cap that divides `padded` (a multiple of 128)."""
    if padded <= cap:
        return padded
    for cand in range(cap, 127, -128):
        if padded % cand == 0:
            return cand
    return 128


def modified_linear_gamma(x, weight, bias, *, gam=GAM):
    """Pallas implementation of ModifiedLinear(transform='gamma').forward.

    x: [..., K] f32; weight: [N, K] (torch Linear layout); bias: [N].
    Returns [..., N] f32.
    """
    N, K = weight.shape
    lead = x.shape[:-1]
    x2 = x.reshape(-1, K).astype(jnp.float32)
    M = x2.shape[0]

    vmem_cap = _vmem_capacity_bytes()
    big_vmem = vmem_cap >= 96 * 1024 * 1024   # v5e/v6e (128 MiB) vs v7x (64 MiB)

    # --- per-generation tile selection ---------------------------------------
    tm_def = 512 if big_vmem else 256
    tn_def = 1024 if big_vmem else 256
    tk_cap = 1024

    n_pad = _round_up(N, 128)
    k_pad = _round_up(K, 128)

    tm = tm_def if M >= tm_def else _round_up(M, 8)
    tn = _largest_tile(n_pad, tn_def)
    tk = _largest_tile(k_pad, tk_cap)
    m_pad = _round_up(M, tm)

    # v7x has 2 TensorCores: expose >= 2 blocks on a parallel axis when possible.
    if (not big_vmem) and (m_pad // tm) * (n_pad // tn) < 2 and n_pad // 2 >= 128:
        tn = _largest_tile(n_pad, max(128, (n_pad // 2) // 128 * 128))

    grid = (n_pad // tn, m_pad // tm, k_pad // tk)   # N, M parallel; K innermost

    # --- pad inputs (zero rows/cols contribute nothing; sliced off afterwards) -
    if m_pad != M or k_pad != K:
        x2 = jnp.pad(x2, ((0, m_pad - M), (0, k_pad - K)))
    w = jnp.asarray(weight, jnp.float32)
    if n_pad != N or k_pad != K:
        w = jnp.pad(w, ((0, n_pad - N), (0, k_pad - K)))

    b = jnp.asarray(bias, jnp.float32)
    relu_b = jnp.maximum(b, 0.0)
    b_rows = jnp.stack(
        [b,
         2.0 * b + gam * relu_b,                       # (b + gam*b+) + b
         2.0 * b + gam * (b - relu_b)],                # (b + gam*b-) + b
        axis=0)                                        # [3, N]
    if n_pad != N:
        b_rows = jnp.pad(b_rows, ((0, 0), (0, n_pad - N)))

    # --- VMEM budget derived from actual buffer sizes -------------------------
    f32b = 4
    stream_bytes = 2 * f32b * tk * (tm + tn)           # double-buffered x + w blocks
    out_bytes = 2 * f32b * tm * tn                     # double-buffered output block
    acc_bytes = 2 * f32b * tm * tn                     # two f32 accumulators
    temp_bytes = 6 * f32b * tm * tk + 3 * f32b * tn * tk  # generous elementwise temps
    needed = stream_bytes + out_bytes + acc_bytes + temp_bytes + 2 * f32b * 3 * tn
    vmem_limit = min(max(32 * 1024 * 1024, 2 * needed), vmem_cap - 16 * 1024 * 1024)
    vmem_limit = max(vmem_limit, needed + 4 * 1024 * 1024)
    vmem_limit = int(min(vmem_limit, vmem_cap - 8 * 1024 * 1024))

    cost = pl.CostEstimate(
        flops=int(6 * M * N * K),                              # 3 matmuls
        transcendentals=0,
        bytes_accessed=int((n_pad // tn) * m_pad * k_pad * 4   # x re-stream per N tile
                           + (m_pad // tm) * n_pad * k_pad * 4  # W re-stream per M tile
                           + m_pad * n_pad * 4))                # output

    out = pl.pallas_call(
        functools.partial(_gamma_linear_kernel, gam=float(gam)),
        out_shape=jax.ShapeDtypeStruct((m_pad, n_pad), jnp.float32),
        grid_spec=pltpu.PrefetchScalarGridSpec(
            num_scalar_prefetch=0,
            grid=grid,
            in_specs=[
                pl.BlockSpec((tm, tk), lambda n, m, k: (m, k)),   # x rows
                pl.BlockSpec((tn, tk), lambda n, m, k: (n, k)),   # W rows (torch layout)
                pl.BlockSpec((3, tn), lambda n, m, k: (0, n)),    # folded bias
            ],
            out_specs=pl.BlockSpec((tm, tn), lambda n, m, k: (m, n)),
            scratch_shapes=[pltpu.VMEM((tm, tn), jnp.float32),    # z accumulator
                            pltpu.VMEM((tm, tn), jnp.float32)],   # pq accumulator
        ),
        compiler_params=pltpu.CompilerParams(
            dimension_semantics=("parallel", "parallel", "arbitrary"),
            vmem_limit_bytes=vmem_limit,
        ),
        cost_estimate=cost,
    )(x2, w, b_rows)

    out = out[:M, :N]
    return out.reshape(lead + (N,))


def _reference(x, weight, bias, gam=GAM):
    """Pure-JAX reference mirroring the PyTorch forward (5-matmul form)."""
    x = x.astype(jnp.float32)
    w = weight.astype(jnp.float32)
    b = bias.astype(jnp.float32)
    z = x @ w.T + b
    w_pos = w + gam * jnp.maximum(w, 0.0)
    w_neg = w + gam * jnp.minimum(w, 0.0)
    b_pos = b + gam * jnp.maximum(b, 0.0)
    b_neg = b + gam * jnp.minimum(b, 0.0)
    xp = jnp.maximum(x, 0.0)
    xn = jnp.minimum(x, 0.0)
    out0 = xp @ w_pos.T + b_pos
    out1 = xn @ w_neg.T + b
    out2 = xp @ w_neg.T + b_neg
    out3 = xn @ w_pos.T + b
    zp = (out0 + out1) * (z > EPS) + (out2 + out3) * (z < EPS)
    return zp * _nan_to_num_f32(z / zp)


if __name__ == "__main__":
    key = jax.random.PRNGKey(0)

    # Test 1: shapes implied by the module (batch, seq, hidden) -> out_features.
    kx, kw, kb, key = jax.random.split(key, 4)
    batch, seq, hidden, out_features = 2, 8, 32, 32
    x = jax.random.normal(kx, (batch, seq, hidden), dtype=jnp.float32)
    weight = jax.random.normal(kw, (out_features, hidden), dtype=jnp.float32) * 0.1
    bias = jax.random.normal(kb, (out_features,), dtype=jnp.float32) * 0.1

    y = jax.block_until_ready(modified_linear_gamma(x, weight, bias))
    np.testing.assert_allclose(np.asarray(y), np.asarray(_reference(x, weight, bias)),
                               rtol=1e-5, atol=1e-5)

    # Test 2: awkward (non-128-multiple) K and N to exercise the padding path.
    kx, kw, kb, key = jax.random.split(key, 4)
    batch, seq, hidden, out_features = 3, 5, 200, 100
    x = jax.random.normal(kx, (batch, seq, hidden), dtype=jnp.float32)
    weight = jax.random.normal(kw, (out_features, hidden), dtype=jnp.float32) * 0.1
    bias = jax.random.normal(kb, (out_features,), dtype=jnp.float32) * 0.1

    y = jax.block_until_ready(modified_linear_gamma(x, weight, bias))
    np.testing.assert_allclose(np.asarray(y), np.asarray(_reference(x, weight, bias)),
                               rtol=1e-5, atol=1e-5)

    print("KERNEL_OK")
</pallas_src>

<mosaic_0001>
module attributes {stable_mosaic.version = 11 : i64} {
  func.func @_gamma_linear_kernel(%arg0: i32, %arg1: i32, %arg2: i32, %arg3: memref<16x128xf32, #tpu.memory_space<vmem>>, %arg4: memref<128x128xf32, #tpu.memory_space<vmem>>, %arg5: memref<3x128xf32, #tpu.memory_space<vmem>>, %arg6: memref<16x128xf32, #tpu.memory_space<vmem>>, %arg7: memref<16x128xf32, #tpu.memory_space<vmem>>, %arg8: memref<16x128xf32, #tpu.memory_space<vmem>>) attributes {dimension_semantics = [#tpu.dimension_semantics<parallel>, #tpu.dimension_semantics<parallel>, #tpu.dimension_semantics<arbitrary>], iteration_bounds = array<i64: 1, 1, 1>, scalar_prefetch = 0 : i64, scratch_operands = 2 : i64, tpu.core_type = #tpu.core_type<tc>, window_params = [{transform_indices = @transform_0, window_bounds = array<i64: 16, 128>}, {transform_indices = @transform_1, window_bounds = array<i64: 128, 128>}, {transform_indices = @transform_2, window_bounds = array<i64: 3, 128>}, {transform_indices = @transform_3, window_bounds = array<i64: 16, 128>}]} {
    %c0_i32 = arith.constant 0 : i32
    %0 = arith.cmpi eq, %arg2, %c0_i32 : i32
    %1 = arith.extui %0 : i1 to i32
    %c0_i32_0 = arith.constant 0 : i32
    %2 = arith.cmpi ne, %1, %c0_i32_0 : i32
    scf.if %2 {
      %cst_18 = arith.constant 0.000000e+00 : f32
      %27 = vector.broadcast %cst_18 : f32 to vector<16x128xf32>
      %c0_19 = arith.constant 0 : index
      %c0_20 = arith.constant 0 : index
      %28 = vector.load %arg7[%c0_19, %c0_20] : memref<16x128xf32, #tpu.memory_space<vmem>>, vector<16x128xf32>
      tpu.vector_store %arg7[%c0_19, %c0_20], %27 {strides = array<i32>} : memref<16x128xf32, #tpu.memory_space<vmem>>, vector<16x128xf32>,
      %cst_21 = arith.constant 0.000000e+00 : f32
      %29 = vector.broadcast %cst_21 : f32 to vector<16x128xf32>
      %c0_22 = arith.constant 0 : index
      %c0_23 = arith.constant 0 : index
      %30 = vector.load %arg8[%c0_22, %c0_23] : memref<16x128xf32, #tpu.memory_space<vmem>>, vector<16x128xf32>
      tpu.vector_store %arg8[%c0_22, %c0_23], %29 {strides = array<i32>} : memref<16x128xf32, #tpu.memory_space<vmem>>, vector<16x128xf32>,
    } else {
    }
    %c0 = arith.constant 0 : index
    %c0_1 = arith.constant 0 : index
    %3 = vector.load %arg3[%c0, %c0_1] : memref<16x128xf32, #tpu.memory_space<vmem>>, vector<16x128xf32>
    %c0_2 = arith.constant 0 : index
    %c0_3 = arith.constant 0 : index
    %4 = vector.load %arg4[%c0_2, %c0_3] : memref<128x128xf32, #tpu.memory_space<vmem>>, vector<128x128xf32>
    %cst = arith.constant 0.000000e+00 : f32
    %5 = vector.broadcast %cst : f32 to vector<16x128xf32>
    %6 = arith.minimumf %3, %5 : vector<16x128xf32>
    %7 = math.absf %3 : vector<16x128xf32>
    %cst_4 = arith.constant 0.000000e+00 : f32
    %8 = vector.broadcast %cst_4 : f32 to vector<128x128xf32>
    %9 = arith.maximumf %4, %8 : vector<128x128xf32>
    %c0_5 = arith.constant 0 : index
    %c0_6 = arith.constant 0 : index
    %10 = vector.load %arg7[%c0_5, %c0_6] : memref<16x128xf32, #tpu.memory_space<vmem>>, vector<16x128xf32>
    %cst_7 = arith.constant dense<0.000000e+00> : vector<16x128xf32>
    %11 = tpu.matmul %3, %4, %cst_7 {dimension_numbers = #tpu.dot_dimension_numbers<[1], [1], [0], [0], [0, 0, 1, 0], [], []>} : vector<16x128xf32>, vector<128x128xf32>, vector<16x128xf32> -> vector<16x128xf32>
    %12 = arith.addf %10, %11 : vector<16x128xf32>
    %c0_8 = arith.constant 0 : index
    %c0_9 = arith.constant 0 : index
    %13 = vector.load %arg7[%c0_8, %c0_9] : memref<16x128xf32, #tpu.memory_space<vmem>>, vector<16x128xf32>
    tpu.vector_store %arg7[%c0_8, %c0_9], %12 {strides = array<i32>} : memref<16x128xf32, #tpu.memory_space<vmem>>, vector<16x128xf32>,
    %14 = arith.truncf %6 : vector<16x128xf32> to vector<16x128xbf16>
    %15 = arith.truncf %4 : vector<128x128xf32> to vector<128x128xbf16>
    %cst_10 = arith.constant dense<0.000000e+00> : vector<16x128xf32>
    %16 = tpu.matmul %14, %15, %cst_10 {dimension_numbers = #tpu.dot_dimension_numbers<[1], [1], [0], [0], [0, 0, 1, 0], [], []>} : vector<16x128xbf16>, vector<128x128xbf16>, vector<16x128xf32> -> vector<16x128xf32>
    %17 = arith.truncf %7 : vector<16x128xf32> to vector<16x128xbf16>
    %18 = arith.truncf %9 : vector<128x128xf32> to vector<128x128xbf16>
    %cst_11 = arith.constant dense<0.000000e+00> : vector<16x128xf32>
    %19 = tpu.matmul %17, %18, %cst_11 {dimension_numbers = #tpu.dot_dimension_numbers<[1], [1], [0], [0], [0, 0, 1, 0], [], []>} : vector<16x128xbf16>, vector<128x128xbf16>, vector<16x128xf32> -> vector<16x128xf32>
    %c0_12 = arith.constant 0 : index
    %c0_13 = arith.constant 0 : index
    %20 = vector.load %arg8[%c0_12, %c0_13] : memref<16x128xf32, #tpu.memory_space<vmem>>, vector<16x128xf32>
    %21 = arith.addf %16, %19 : vector<16x128xf32>
    %22 = arith.addf %20, %21 : vector<16x128xf32>
    %c0_14 = arith.constant 0 : index
    %c0_15 = arith.constant 0 : index
    %23 = vector.load %arg8[%c0_14, %c0_15] : memref<16x128xf32, #tpu.memory_space<vmem>>, vector<16x128xf32>
    tpu.vector_store %arg8[%c0_14, %c0_15], %22 {strides = array<i32>} : memref<16x128xf32, #tpu.memory_space<vmem>>, vector<16x128xf32>,
    %c0_i32_16 = arith.constant 0 : i32
    %24 = arith.cmpi eq, %arg2, %c0_i32_16 : i32
    %25 = arith.extui %24 : i1 to i32
    %c0_i32_17 = arith.constant 0 : i32
    %26 = arith.cmpi ne, %25, %c0_i32_17 : i32
    scf.if %26 {
      %c0_18 = arith.constant 0 : index
      %c0_19 = arith.constant 0 : index
      %27 = vector.load %arg7[%c0_18, %c0_19] : memref<16x128xf32, #tpu.memory_space<vmem>>, vector<16x128xf32>
      %c0_20 = arith.constant 0 : index
      %c0_21 = arith.constant 0 : index
      %28 = vector.load %arg8[%c0_20, %c0_21] : memref<16x128xf32, #tpu.memory_space<vmem>>, vector<16x128xf32>
      %c0_22 = arith.constant 0 : index
      %c0_23 = arith.constant 0 : index
      %29 = vector.load %arg5[%c0_22, %c0_23] : memref<3x128xf32, #tpu.memory_space<vmem>>, vector<3x128xf32>
      %30 = vector.extract_strided_slice %29 {offsets = [0, 0], sizes = [1, 128], strides = [1, 1]} : vector<3x128xf32> to vector<1x128xf32>
      %31 = vector.extract_strided_slice %29 {offsets = [1, 0], sizes = [1, 128], strides = [1, 1]} : vector<3x128xf32> to vector<1x128xf32>
      %32 = vector.extract_strided_slice %29 {offsets = [2, 0], sizes = [1, 128], strides = [1, 1]} : vector<3x128xf32> to vector<1x128xf32>
      %33 = vector.broadcast %30 : vector<1x128xf32> to vector<16x128xf32>
      %34 = arith.addf %27, %33 : vector<16x128xf32>
      %cst_24 = arith.constant 5.000000e-02 : f32
      %35 = vector.broadcast %cst_24 : f32 to vector<16x128xf32>
      %36 = arith.mulf %35, %28 : vector<16x128xf32>
      %37 = arith.addf %27, %36 : vector<16x128xf32>
      %38 = vector.broadcast %31 : vector<1x128xf32> to vector<16x128xf32>
      %39 = arith.addf %37, %38 : vector<16x128xf32>
      %cst_25 = arith.constant 1.050000e+00 : f32
      %40 = vector.broadcast %cst_25 : f32 to vector<16x128xf32>
      %41 = arith.mulf %40, %27 : vector<16x128xf32>
      %cst_26 = arith.constant 5.000000e-02 : f32
      %42 = vector.broadcast %cst_26 : f32 to vector<16x128xf32>
      %43 = arith.mulf %42, %28 : vector<16x128xf32>
      %44 = arith.subf %41, %43 : vector<16x128xf32>
      %45 = vector.broadcast %32 : vector<1x128xf32> to vector<16x128xf32>
      %46 = arith.addf %44, %45 : vector<16x128xf32>
      %cst_27 = arith.constant 9.99999997E-7 : f32
      %47 = vector.broadcast %cst_27 : f32 to vector<16x128xf32>
      %48 = arith.cmpf ogt, %34, %47 : vector<16x128xf32>
      %cst_28 = arith.constant 0.000000e+00 : f32
      %49 = vector.broadcast %cst_28 : f32 to vector<16x128xf32>
      %50 = arith.select %48, %39, %49 : vector<16x128xi1>, vector<16x128xf32>
      %cst_29 = arith.constant 9.99999997E-7 : f32
      %51 = vector.broadcast %cst_29 : f32 to vector<16x128xf32>
      %52 = arith.cmpf olt, %34, %51 : vector<16x128xf32>
      %cst_30 = arith.constant 0.000000e+00 : f32
      %53 = vector.broadcast %cst_30 : f32 to vector<16x128xf32>
      %54 = arith.select %52, %46, %53 : vector<16x128xi1>, vector<16x128xf32>
      %55 = arith.addf %50, %54 : vector<16x128xf32>
      %56 = arith.divf %34, %55 : vector<16x128xf32>
      %57 = arith.cmpf one, %56, %56 : vector<16x128xf32>
      %cst_31 = arith.constant 0.000000e+00 : f32
      %58 = vector.broadcast %cst_31 : f32 to vector<16x128xf32>
      %59 = arith.select %57, %58, %56 : vector<16x128xi1>, vector<16x128xf32>
      %cst_32 = arith.constant 0x7F800000 : f32
      %60 = vector.broadcast %cst_32 : f32 to vector<16x128xf32>
      %61 = arith.cmpf oeq, %59, %60 : vector<16x128xf32>
      %cst_33 = arith.constant 3.40282347E+38 : f32
      %62 = vector.broadcast %cst_33 : f32 to vector<16x128xf32>
      %63 = arith.select %61, %62, %59 : vector<16x128xi1>, vector<16x128xf32>
      %cst_34 = arith.constant 0xFF800000 : f32
      %64 = vector.broadcast %cst_34 : f32 to vector<16x128xf32>
      %65 = arith.cmpf oeq, %63, %64 : vector<16x128xf32>
      %cst_35 = arith.constant -3.40282347E+38 : f32
      %66 = vector.broadcast %cst_35 : f32 to vector<16x128xf32>
      %67 = arith.select %65, %66, %63 : vector<16x128xi1>, vector<16x128xf32>
      %68 = arith.mulf %55, %67 : vector<16x128xf32>
      %c0_36 = arith.constant 0 : index
      %c0_37 = arith.constant 0 : index
      %69 = vector.load %arg6[%c0_36, %c0_37] : memref<16x128xf32, #tpu.memory_space<vmem>>, vector<16x128xf32>
      tpu.vector_store %arg6[%c0_36, %c0_37], %68 {strides = array<i32>} : memref<16x128xf32, #tpu.memory_space<vmem>>, vector<16x128xf32>,
    } else {
    }
    return
  }
  func.func @transform_0(%arg0: i32, %arg1: i32, %arg2: i32) -> (i32, i32) {
    %c0_i32 = arith.constant 0 : i32
    return %arg1, %arg2 : i32, i32
  }
  func.func @transform_1(%arg0: i32, %arg1: i32, %arg2: i32) -> (i32, i32) {
    %c0_i32 = arith.constant 0 : i32
    return %arg0, %arg2 : i32, i32
  }
  func.func @transform_2(%arg0: i32, %arg1: i32, %arg2: i32) -> (i32, i32) {
    %c0_i32 = arith.constant 0 : i32
    %c0_i32_0 = arith.constant 0 : i32
    return %c0_i32, %arg0 : i32, i32
  }
  func.func @transform_3(%arg0: i32, %arg1: i32, %arg2: i32) -> (i32, i32) {
    %c0_i32 = arith.constant 0 : i32
    return %arg1, %arg0 : i32, i32
  }
}

</mosaic_0001>

<bundles_post_ra>
// kernel: tpu_custom_call.1
= control target key start
LH: loop header
LB: loop body
LE: loop exit
PB: predicated region body
PF: predicated region fallthrough
CT: control target
= control target key end

     0   :  { %8 = vsyncpa [#allocation5], 0  ;;  %s712_s0 = inlined_call_operand.hbm [shape: f32[16,128], index: 0, kind: input, shape index: {}]   ;;  %s713_s1 = inlined_call_operand.hbm [shape: f32[128,128], index: 1, kind: input, shape index: {}]   ;;  %s714_s2 = inlined_call_operand.vmem [shape: f32[3,128], index: 2, kind: input, shape index: {}]   ;;  %s715_s3 = inlined_call_operand.hbm [shape: f32[16,128], index: 3, kind: output, shape index: {}]  }
   0x1   :  { %9 = vsyncpa [#allocation8], 0 }
   0x2   :  { %10 = vsyncpa [#allocation6], 0  ;;  %s589_s12 = smov [#allocation4]   ;;  %s517_s16 = scalar_lea.hbm %s712_s0, 256 }
   0x3   :  { %s16_s13 = sshll.u32 %s589_s12, 4  ;;  %p518_p0 = scmp.ne.s32.totalorder %s712_s0, %s517_s16  ;;  %s17_s13 = int_to_ptr.vmem [resolvable:$true] %s16_s13 }
   0x4   :  { %p521_p1 = scmp.lt.u32.totalorder %s517_s16, %s712_s0 }
   0x6   :  { %p523_p2 = pnand %p521_p1, %p518_p0 }
   0x8   :  { %526 = shalt.err (!%p523_p2)
}
   0x9   :  { %s527_s21 = scalar_lea.vmem %s17_s13, 256  ;;  %p532_p4 = scmp.lt.s32.totalorder %s17_s13, %s17_s13 }
   0xa   :  { %p528_p3 = scmp.ne.s32.totalorder %s17_s13, %s527_s21  ;;  %p533_p5 = scmp.lt.s32.totalorder %s527_s21, %s527_s21 }
   0xc   :  { %p534_p6 = por %p533_p5, %p532_p4 }
   0xe   :  { %p535_p7 = pnand %p534_p6, %p528_p3 }
  0x10   :  { %538 = shalt.err (!%p535_p7)
}
  0x11   :  { %s590_s22 = smov 128   ;;  %s591_s23 = smov 8  }
  0x12   :  { %22 = dma.hbm_to_vmem [thread:$0]  %s712_s0, 256, %s17_s13, [#allocation5], %s590_s22, %s590_s22, %s591_s23  }
  0x13   :  { %s592_s26 = smov [#allocation7]   ;;  %s539_s30 = scalar_lea.hbm %s713_s1, 2048 }
  0x14   :  { %s28_s27 = sshll.u32 %s592_s26, 4  ;;  %p540_p8 = scmp.ne.s32.totalorder %s713_s1, %s539_s30  ;;  %s29_s27 = int_to_ptr.vmem [resolvable:$true] %s28_s27 }
  0x15   :  { %p543_p9 = scmp.lt.u32.totalorder %s539_s30, %s713_s1 }
  0x17   :  { %p545_p10 = pnand %p543_p9, %p540_p8 }
  0x19   :  { %548 = shalt.err (!%p545_p10)
}
  0x1a   :  { %s549_s8 = scalar_lea.vmem %s29_s27, 2048  ;;  %p554_p12 = scmp.lt.s32.totalorder %s29_s27, %s29_s27 }
  0x1b   :  { %p550_p11 = scmp.ne.s32.totalorder %s29_s27, %s549_s8  ;;  %p555_p13 = scmp.lt.s32.totalorder %s549_s8, %s549_s8 }
  0x1d   :  { %p556_p0 = por %p555_p13, %p554_p12 }
  0x1f   :  { %p557_p1 = pnand %p556_p0, %p550_p11 }
  0x21   :  { %560 = shalt.err (!%p557_p1)
}
  0x22   :  { %34 = dma.hbm_to_vmem [thread:$0]  %s713_s1, 2048, %s29_s27, [#allocation8], %s590_s22, %s590_s22, %s591_s23  }
  0x23   :  { %583 = dma.done.wait [#allocation5], 256  }
  0x24   :  { %584 = vsyncadd [#allocation5], 4294967040 }
  0x25   :  { %585 = dma.done.wait [#allocation8], 2048  }
  0x26   :  { %586 = vsyncadd [#allocation8], 4294965248  ;;  %v593_v0 = vmov 0.0   ;;  %vm594_vm0 = vmmov 0   ;;  %v54_v1 = vld [vmem:[#allocation7] sm:$0xff]  ;;  %v55_v2 = vld [vmem:[#allocation7 + $0x8] sm:$0xff]  ;;  %v285_v59 = vlaneseq }
  0x27   :  { %430 = vmatprep.subr.bf16.mxu1 %v593_v0  ;;  %446 = vmatprep.mubr.msk.bf16.mxu1 %vm594_vm0, %v593_v0  ;;  %v74_v3 = vmax.f32 %v54_v1, 0.0  ;;  %v75_v4 = vmax.f32 %v55_v2, 0.0  ;;  %v56_v5 = vld [vmem:[#allocation7 + $0x10] sm:$0xff]  ;;  %v57_v6 = vld [vmem:[#allocation7 + $0x18] sm:$0xff]  ;;  %v649_v7 = vpack.c.bf16 %v55_v2, %v54_v1  ;;  %v58_v13 = vld [vmem:[#allocation7 + $0x20] sm:$0xff] }
  0x28   :  { %v651_v8 = vpack.c.bf16 %v57_v6, %v56_v5  ;;  %v76_v10 = vmax.f32 %v56_v5, 0.0  ;;  %v77_v11 = vmax.f32 %v57_v6, 0.0  ;;  %v655_v12 = vld [vmem:[#allocation4] sm:$0xff]  ;;  %v59_v14 = vld [vmem:[#allocation7 + $0x28] sm:$0xff]  ;;  %v660_v16 = vld [vmem:[#allocation4 + $0x8] sm:$0xff]  ;;  %v78_v21 = vmax.f32 %v58_v13, 0.0 }
  0x29   :  { %v181_v9 = vpack.c.bf16 %v75_v4, %v74_v3  ;;  %471 = vmatprep.subr.bf16.mxu0 %v649_v7  ;;  %427 = vmatprep.mubr.f32.mxu0 %v655_v12  ;;  %v662_v17 = vpack.c.bf16 %v59_v14, %v58_v13  ;;  %v70_v18 = vmin.f32 %v655_v12, 0.0  ;;  %v71_v19 = vmin.f32 %v660_v16, 0.0  ;;  %v60_v23 = vld [vmem:[#allocation7 + $0x30] sm:$0xff]  ;;  %v61_v24 = vld [vmem:[#allocation7 + $0x38] sm:$0xff]  ;;  %v62_v29 = vld [vmem:[#allocation7 + $0x40] sm:$0xff] }
  0x2a   :  { %473 = vmatpush3.bf16.xpose.msra.mxu0 %v649_v7  ;;  %v182_v15 = vpack.c.bf16 %v77_v11, %v76_v10  ;;  %v79_v22 = vmax.f32 %v59_v14, 0.0  ;;  %v482_v26 = vpack.c.bf16 %v61_v24, %v60_v23  ;;  %v80_v27 = vmax.f32 %v60_v23, 0.0  ;;  %v63_v30 = vld [vmem:[#allocation7 + $0x48] sm:$0xff]  ;;  %v64_v35 = vld [vmem:[#allocation7 + $0x50] sm:$0xff]  ;;  %v65_v36 = vld [vmem:[#allocation7 + $0x58] sm:$0xff] }
  0x2b   :  { %431 = vmatpush3.bf16.xpose.msra.mxu1 %v181_v9  ;;  %475 = vmatprep.subr.bf16.mxu0 %v651_v8  ;;  %v667_v20 = vpack.c.bf16 %v71_v19, %v70_v18  ;;  %v81_v28 = vmax.f32 %v61_v24, 0.0  ;;  %v486_v32 = vpack.c.bf16 %v63_v30, %v62_v29  ;;  %v82_v33 = vmax.f32 %v62_v29, 0.0  ;;  %v66_v41 = vld [vmem:[#allocation7 + $0x60] sm:$0xff]  ;;  %v67_v42 = vld [vmem:[#allocation7 + $0x68] sm:$0xff]  ;;  %v68_v47 = vld [vmem:[#allocation7 + $0x70] sm:$0xff] }
  0x2c   :  { %432 = vmatprep.subr.bf16.mxu1 %v593_v0  ;;  %v183_v25 = vpack.c.bf16 %v79_v22, %v78_v21  ;;  %v83_v34 = vmax.f32 %v63_v30, 0.0  ;;  %v490_v38 = vpack.c.bf16 %v65_v36, %v64_v35  ;;  %v84_v39 = vmax.f32 %v64_v35, 0.0  ;;  %v69_v48 = vld [vmem:[#allocation7 + $0x78] sm:$0xff]  ;;  %v284_v62 = vld [vmem:[%s714_s2] sm:$0x7]  ;;  %s595_s2 = smov [#allocation9]  }
  0x2d   :  { %v184_v31 = vpack.c.bf16 %v81_v28, %v80_v27  ;;  %v85_v40 = vmax.f32 %v65_v36, 0.0  ;;  %v494_v44 = vpack.c.bf16 %v67_v42, %v66_v41  ;;  %v86_v45 = vmax.f32 %v66_v41, 0.0  ;;  %s346_s11 = sshll.u32 %s595_s2, 4  ;;  %s347_s11 = int_to_ptr.vmem [resolvable:$true] %s346_s11 }
  0x2e   :  { %v185_v37 = vpack.c.bf16 %v83_v34, %v82_v33  ;;  %v87_v46 = vmax.f32 %v67_v42, 0.0  ;;  %v498_v50 = vpack.c.bf16 %v69_v48, %v68_v47  ;;  %v88_v51 = vmax.f32 %v68_v47, 0.0  ;;  %s561_s12 = scalar_lea.vmem %s347_s11, 256  ;;  %p566_p3 = scmp.lt.s32.totalorder %s347_s11, %s347_s11 }
  0x2f   :  { %v186_v43 = vpack.c.bf16 %v85_v40, %v84_v39  ;;  %v89_v52 = vmax.f32 %v69_v48, 0.0  ;;  %v72_v54 = vand.u32 2147483647, %v655_v12  ;;  %v73_v55 = vand.u32 2147483647, %v660_v16  ;;  %p562_p2 = scmp.ne.s32.totalorder %s347_s11, %s561_s12  ;;  %p567_p4 = scmp.lt.s32.totalorder %s561_s12, %s561_s12 }
  0x30   :  { %v187_v49 = vpack.c.bf16 %v87_v46, %v86_v45  ;;  %v286_v60 = vshrl.u32 %v285_v59, 7 }
  0x31   :  { %v188_v53 = vpack.c.bf16 %v89_v52, %v88_v51  ;;  %v180_v56 = vpack.c.bf16 %v73_v55, %v72_v54  ;;  %p568_p5 = por %p567_p4, %p566_p3 }
  0x32   :  { %477 = vmatpush3.bf16.xpose.msra.mxu0 %v651_v8  ;;  %v287_v61 = vsub.s32 0, %v286_v60  ;;  %v297_v63 = vsub.s32 1, %v286_v60  ;;  %v307_v1 = vsub.s32 2, %v286_v60 }
  0x33   :  { %433 = vmatpush3.bf16.xpose.msra.mxu1 %v182_v15  ;;  %479 = vmatprep.subr.bf16.mxu0 %v662_v17  ;;  %p569_p6 = pnand %p568_p5, %p562_p2 }
  0x34   :  { %434 = vmatprep.subr.bf16.mxu1 %v593_v0  ;;  %v288_v2 = vrot.slane %v284_v62, %v287_v61 }
  0x3a   :  { %481 = vmatpush3.bf16.xpose.msra.mxu0 %v662_v17 }
  0x3b   :  { %435 = vmatpush3.bf16.xpose.msra.mxu1 %v183_v25  ;;  %483 = vmatprep.subr.bf16.mxu0 %v482_v26 }
  0x3c   :  { %436 = vmatprep.subr.bf16.mxu1 %v593_v0 }
  0x42   :  { %485 = vmatpush3.bf16.xpose.msra.mxu0 %v482_v26 }
  0x43   :  { %437 = vmatpush3.bf16.xpose.msra.mxu1 %v184_v31  ;;  %487 = vmatprep.subr.bf16.mxu0 %v486_v32 }
  0x44   :  { %438 = vmatprep.subr.bf16.mxu1 %v593_v0 }
  0x4a   :  { %489 = vmatpush3.bf16.xpose.msra.mxu0 %v486_v32 }
  0x4b   :  { %439 = vmatpush3.bf16.xpose.msra.mxu1 %v185_v37  ;;  %491 = vmatprep.subr.bf16.mxu0 %v490_v38 }
  0x4c   :  { %440 = vmatprep.subr.bf16.mxu1 %v593_v0 }
  0x52   :  { %493 = vmatpush3.bf16.xpose.msra.mxu0 %v490_v38 }
  0x53   :  { %441 = vmatpush3.bf16.xpose.msra.mxu1 %v186_v43  ;;  %495 = vmatprep.subr.bf16.mxu0 %v494_v44 }
  0x54   :  { %442 = vmatprep.subr.bf16.mxu1 %v593_v0 }
  0x5a   :  { %497 = vmatpush3.bf16.xpose.msra.mxu0 %v494_v44 }
  0x5b   :  { %443 = vmatpush3.bf16.xpose.msra.mxu1 %v187_v49  ;;  %499 = vmatprep.subr.bf16.mxu0 %v498_v50 }
  0x5c   :  { %444 = vmatprep.subr.bf16.mxu1 %v593_v0 }
  0x62   :  { %501 = vmatpush3.bf16.xpose.msra.mxu0 %v498_v50 }
  0x63   :  { %445 = vmatpush3.bf16.xpose.msra.mxu1 %v188_v53 }
  0x64   :  { %450 = vmatprep.subr.bf16.mxu1 %v593_v0 }
  0x69   :  { %428 = vmatmul.mubr.f32.vlgmr.msra.gmra.mrb[0].mxu0 %v660_v16 }
  0x6a   :  { %447 = vmatmul.mubr.bf16.vlgmr.msra.gmra.mrb[0].mxu1 %v180_v56 }
  0x6b   :  { %451 = vmatpush3.bf16.xpose.msra.mxu1 %v649_v7  ;;  %466 = vmatprep.mubr.msk.bf16.mxu1 %vm594_vm0, %v593_v0  ;;  %v308_v7 = vrot.slane %v284_v62, %v307_v1 }
  0x6c   :  { %452 = vmatprep.subr.bf16.mxu1 %v593_v0 }
  0x73   :  { %453 = vmatpush3.bf16.xpose.msra.mxu1 %v651_v8 }
  0x74   :  { %454 = vmatprep.subr.bf16.mxu1 %v593_v0 }
  0x7b   :  { %455 = vmatpush3.bf16.xpose.msra.mxu1 %v662_v17 }
  0x7c   :  { %456 = vmatprep.subr.bf16.mxu1 %v593_v0 }
  0x83   :  { %457 = vmatpush3.bf16.xpose.msra.mxu1 %v482_v26 }
  0x84   :  { %458 = vmatprep.subr.bf16.mxu1 %v593_v0 }
  0x8b   :  { %459 = vmatpush3.bf16.xpose.msra.mxu1 %v486_v32 }
  0x8c   :  { %460 = vmatprep.subr.bf16.mxu1 %v593_v0 }
  0x93   :  { %461 = vmatpush3.bf16.xpose.msra.mxu1 %v490_v38 }
  0x94   :  { %462 = vmatprep.subr.bf16.mxu1 %v593_v0 }
  0x9b   :  { %463 = vmatpush3.bf16.xpose.msra.mxu1 %v494_v44 }
  0x9c   :  { %464 = vmatprep.subr.bf16.mxu1 %v593_v0  ;;  %v298_v0 = vrot.slane %v284_v62, %v297_v63 }
  0xa3   :  { %465 = vmatpush3.bf16.xpose.msra.mxu1 %v498_v50 }
  0xaa   :  { %467 = vmatmul.mubr.bf16.vlgmr.msra.gmra.mrb[0].mxu1 %v667_v20 }
 0x13c   :  { %v429_v57 = vpop.f32.mrb[0].mxu0 }
 0x13d   :  { %v158_v58 = vpop.f32.mrb[1].mxu0  ;;  %v302_v5 = vmul.f32 1.05, %v429_v57  ;;  %v290_v15 = vadd.f32 %v429_v57, %v288_v2 }
 0x13e   :  { %v301_v3 = vmul.f32 1.05, %v158_v58  ;;  %v289_v9 = vadd.f32 %v288_v2, %v158_v58 }
 0x13f   :  { %vm312_vm3 = vcmp.gt.f32.partialorder %v290_v15, 1e-06  ;;  %vm316_vm4 = vcmp.lt.f32.partialorder %v290_v15, 1e-06 }
 0x140   :  { %vm311_vm1 = vcmp.gt.f32.partialorder %v289_v9, 1e-06  ;;  %vm315_vm2 = vcmp.lt.f32.partialorder %v289_v9, 1e-06 }
 0x17d   :  { %v266_v4 = vpop.f32.mrb[0].mxu1 }
 0x17e   :  { %v291_v6 = vmul.f32 0.05, %v266_v4  ;;  %v468_v8 = vpop.f32.mrb[1].mxu1 }
 0x17f   :  { %v269_v10 = vpop.f32.mrb[2].mxu1 }
 0x180   :  { %v293_v11 = vadd.f32 %v291_v6, %v158_v58  ;;  %v303_v12 = vsub.f32 %v301_v3, %v291_v6  ;;  %v292_v13 = vmul.f32 0.05, %v269_v10  ;;  %v469_v14 = vpop.f32.mrb[3].mxu1 }
 0x182   :  { %v299_v16 = vadd.f32 %v298_v0, %v293_v11  ;;  %v309_v17 = vadd.f32 %v308_v7, %v303_v12  ;;  %v294_v18 = vadd.f32 %v429_v57, %v292_v13  ;;  %v304_v19 = vsub.f32 %v302_v5, %v292_v13 }
 0x184   :  { %v313_v20 = vsel %vm311_vm1, %v299_v16, 0.0  ;;  %v317_v21 = vsel %vm315_vm2, %v309_v17, 0.0  ;;  %v300_v22 = vadd.f32 %v298_v0, %v294_v18  ;;  %v310_v23 = vadd.f32 %v308_v7, %v304_v19 }
 0x185   :  { %v319_v24 = vadd.f32 %v317_v21, %v313_v20 }
 0x186   :  { %v314_v25 = vsel %vm312_vm3, %v300_v22, 0.0  ;;  %v318_v26 = vsel %vm316_vm4, %v310_v23, 0.0 }
 0x187   :  { %v320_v27 = vadd.f32 %v318_v26, %v314_v25  ;;  %513 = vrcp.f32 %v319_v24 }
 0x189   :  { %515 = vrcp.f32 %v320_v27 }
 0x191   :  { %v514_v28 = vpop.eup %513 }
 0x192   :  { %v322_v29 = vmul.f32 %v514_v28, %v289_v9 }
 0x193   :  { %v516_v30 = vpop.eup %515 }
 0x194   :  { %v324_v31 = vmul.f32 %v516_v30, %v290_v15  ;;  %vm325_vm5 = vcmp.ne.f32.partialorder %v322_v29, %v322_v29 }
 0x195   :  { %v327_v32 = vsel %vm325_vm5, 0.0, %v322_v29 }
 0x196   :  { %vm326_vm6 = vcmp.ne.f32.partialorder %v324_v31, %v324_v31  ;;  %vm329_vm7 = vcmp.eq.f32.partialorder %v327_v32, inf }
 0x197   :  { %v328_v33 = vsel %vm326_vm6, 0.0, %v324_v31  ;;  %v331_v34 = vsel %vm329_vm7, 3.4028235e+38, %v327_v32 }
 0x198   :  { %vm330_vm8 = vcmp.eq.f32.partialorder %v328_v33, inf  ;;  %vm333_vm9 = vcmp.eq.f32.partialorder %v331_v34, -inf }
 0x199   :  { %v332_v35 = vsel %vm330_vm8, 3.4028235e+38, %v328_v33  ;;  %v335_v36 = vsel %vm333_vm9, -3.4028235e+38, %v331_v34 }
 0x19a   :  { %vm334_vm10 = vcmp.eq.f32.partialorder %v332_v35, -inf  ;;  %v337_v37 = vmul.f32 %v335_v36, %v319_v24 }
 0x19b   :  { %v336_v38 = vsel %vm334_vm10, -3.4028235e+38, %v332_v35 }
 0x19c   :  { %v338_v39 = vmul.f32 %v336_v38, %v320_v27  ;;  %339 = vst [vmem:[#allocation9] sm:$0xff] %v337_v37 }
 0x19e   :  { %340 = vst [vmem:[#allocation9 + $0x8] sm:$0xff] %v338_v39 }
 0x19f   :  { %572 = shalt.err (!%p569_p6)
}
 0x1a0   :  { %s573_s15 = scalar_lea.hbm %s715_s3, 256 }
 0x1a1   :  { %p574_p7 = scmp.ne.s32.totalorder %s715_s3, %s573_s15  ;;  %p577_p8 = scmp.lt.u32.totalorder %s573_s15, %s715_s3 }
 0x1a3   :  { %p579_p9 = pnand %p577_p8, %p574_p7 }
 0x1a5   :  { %582 = shalt.err (!%p579_p9)
}
 0x1a6   :  { %352 = dma.vmem_to_hbm [thread:$0]  %s347_s11, 256, %s715_s3, [#allocation6], %s590_s22, %s590_s22, %s591_s23  }
 0x1a7   :  { %587 = dma.done.wait [#allocation6], 256  }
 0x1a8   :  { %588 = vsyncadd [#allocation6], 4294967040 }
 0x1a9   :  { %356 = vsyncpa [#allocation5], 1 }
 0x1aa   :  { %357 = vsyncpa [#allocation8], 1 }
 0x1ab   :  { %358 = vsyncpa [#allocation6], 1 }

</bundles_post_ra>
